<compile_context>
chip_gen: v7x
topology: tpu7x:2x2x1
jax: 0.10.0
libtpu: 0.0.40
codegen_flags: <defaults>
</compile_context>

<pallas_src>
import functools

import jax
import jax.numpy as jnp
from jax.experimental import pallas as pl
from jax.experimental.pallas import tpu as pltpu

_LANES = 128
_MAX_TILE_ROWS = 512   # 512*128*4 B = 256 KiB per (input, pipeline buffer)


def _hrl_kernel(num_levels, *args):
    # args = (wts_ref, x_ref_0..x_ref_{L-1}, t_ref, total_ref, levels_ref, acc_ref)
    wts_ref = args[0]
    x_refs = args[1:1 + num_levels]
    t_ref = args[1 + num_levels]
    total_ref = args[2 + num_levels]
    levels_ref = args[3 + num_levels]
    acc_ref = args[4 + num_levels]

    step = pl.program_id(0)

    @pl.when(step == 0)
    def _init():
        acc_ref[...] = jnp.zeros_like(acc_ref)

    # Target tile is loaded once per grid step and reused by all levels.
    t = t_ref[...].astype(jnp.float32)
    for l in range(num_levels):                 # static unroll, L is small
        d = x_refs[l][...].astype(jnp.float32) - t
        acc_ref[l] += d * d                     # pure VPU accumulation

    @pl.when(step == pl.num_programs(0) - 1)
    def _finalize():
        total = jnp.float32(0.0)
        for l in range(num_levels):
            lvl = jnp.sum(acc_ref[l]) * wts_ref[l]   # weight has 1/N folded in
            levels_ref[0, l] = lvl
            total = total + lvl
        total_ref[0, 0] = total


def _to_slab(x, rows_pad):
    """Flatten to 1-D, zero-pad, reshape to a lane-dense (rows_pad, 128) slab."""
    n = x.size
    flat = x.reshape(-1)
    n_pad = rows_pad * _LANES
    if n_pad != n:
        flat = jnp.pad(flat, (0, n_pad - n))
    return flat.reshape(rows_pad, _LANES)


def hierarchical_reconstruction_loss(weight_dict, inputs, target,
                                     return_all_levels=False):
    # TODO(synk): the PyTorch module's reconstruction_loss is injectable; this
    # kernel hard-codes the standard MSE ('mean' reduction) reconstruction loss.
    keys = list(weight_dict.keys())
    assert set(keys) == set(inputs.keys())
    for k in keys:
        assert inputs[k].shape == target.shape, (k, inputs[k].shape, target.shape)

    num_levels = len(keys)
    n = int(target.size)
    rows = (n + _LANES - 1) // _LANES
    tile_rows = min(_MAX_TILE_ROWS, ((rows + 7) // 8) * 8)
    rows_pad = ((rows + tile_rows - 1) // tile_rows) * tile_rows
    grid_steps = rows_pad // tile_rows

    level_slabs = [_to_slab(inputs[k], rows_pad) for k in keys]
    target_slab = _to_slab(target, rows_pad)
    # Fold 1/N (MSE mean) into the per-level weights; zero padding adds 0 to sums.
    wts = jnp.asarray([float(weight_dict[k]) for k in keys],
                      dtype=jnp.float32) / jnp.float32(n)

    slab_spec = pl.BlockSpec((tile_rows, _LANES), lambda r, wts_ref: (r, 0))
    grid_spec = pltpu.PrefetchScalarGridSpec(
        num_scalar_prefetch=1,
        grid=(grid_steps,),
        in_specs=[slab_spec] * (num_levels + 1),
        out_specs=(
            pl.BlockSpec(memory_space=pltpu.MemorySpace.SMEM),
            pl.BlockSpec(memory_space=pltpu.MemorySpace.SMEM),
        ),
        scratch_shapes=[pltpu.VMEM((num_levels, tile_rows, _LANES), jnp.float32)],
    )

    total, levels = pl.pallas_call(
        functools.partial(_hrl_kernel, num_levels),
        out_shape=(
            jax.ShapeDtypeStruct((1, 1), jnp.float32),
            jax.ShapeDtypeStruct((1, num_levels), jnp.float32),
        ),
        grid_spec=grid_spec,
        compiler_params=pltpu.CompilerParams(
            dimension_semantics=("arbitrary",)),
    )(wts, *level_slabs, target_slab)

    recon_loss = total[0, 0]
    if return_all_levels:
        all_levels = {k: levels[0, i] for i, k in enumerate(keys)}
        return recon_loss, all_levels
    return recon_loss


# Pure-JAX reference for correctness checking.
def _reference(weight_dict, inputs, target):
    total = jnp.float32(0.0)
    levels = {}
    for l, w in weight_dict.items():
        diff = inputs[l].astype(jnp.float32) - target.astype(jnp.float32)
        levels[l] = jnp.float32(w) * jnp.mean(diff * diff)
        total = total + levels[l]
    return total, levels


if __name__ == "__main__":
    key = jax.random.PRNGKey(0)

    # Hierarchical decoder outputs: 3 levels, each already at the target
    # resolution (all levels are compared against the same target).
    B, C, H, W = 2, 4, 16, 16
    weight_dict = {0: 1.0, 1: 0.5, 2: 0.25}

    key, kt = jax.random.split(key)
    target = jax.random.normal(kt, (B, C, H, W), jnp.float32)
    inputs = {}
    for l in weight_dict:
        key, kx = jax.random.split(key)
        inputs[l] = jax.random.normal(kx, (B, C, H, W), jnp.float32)

    loss, per_level = hierarchical_reconstruction_loss(
        weight_dict, inputs, target, return_all_levels=True)
    loss = jax.block_until_ready(loss)
    jax.block_until_ready(per_level)

    ref_loss, ref_levels = _reference(weight_dict, inputs, target)
    assert jnp.allclose(loss, ref_loss, rtol=1e-5, atol=1e-6), (loss, ref_loss)
    for l in weight_dict:
        assert jnp.allclose(per_level[l], ref_levels[l], rtol=1e-5, atol=1e-6), (
            l, per_level[l], ref_levels[l])

    # Second case exercises the zero-padded tail (element count not a multiple
    # of 8*128).
    B2, C2, H2, W2 = 2, 3, 7, 5
    key, kt2 = jax.random.split(key)
    target2 = jax.random.normal(kt2, (B2, C2, H2, W2), jnp.float32)
    inputs2 = {}
    for l in weight_dict:
        key, kx2 = jax.random.split(key)
        inputs2[l] = jax.random.normal(kx2, (B2, C2, H2, W2), jnp.float32)

    loss2 = jax.block_until_ready(
        hierarchical_reconstruction_loss(weight_dict, inputs2, target2))
    ref_loss2, _ = _reference(weight_dict, inputs2, target2)
    assert jnp.allclose(loss2, ref_loss2, rtol=1e-5, atol=1e-6), (loss2, ref_loss2)

    print("KERNEL_OK")
</pallas_src>

<mosaic_0001>
module attributes {stable_mosaic.version = 11 : i64} {
  func.func @_hrl_kernel(%arg0: i32, %arg1: memref<3xf32, #tpu.memory_space<smem>>, %arg2: memref<16x128xf32, #tpu.memory_space<vmem>>, %arg3: memref<16x128xf32, #tpu.memory_space<vmem>>, %arg4: memref<16x128xf32, #tpu.memory_space<vmem>>, %arg5: memref<16x128xf32, #tpu.memory_space<vmem>>, %arg6: memref<1x1xf32, #tpu.memory_space<smem>>, %arg7: memref<1x3xf32, #tpu.memory_space<smem>>, %arg8: memref<3x16x128xf32, #tpu.memory_space<vmem>>) attributes {dimension_semantics = [#tpu.dimension_semantics<arbitrary>], iteration_bounds = array<i64: 1>, scalar_prefetch = 1 : i64, scratch_operands = 1 : i64, tpu.core_type = #tpu.core_type<tc>, window_params = [{transform_indices = @transform_0, window_bounds = array<i64: 16, 128>}, {transform_indices = @transform_1, window_bounds = array<i64: 16, 128>}, {transform_indices = @transform_2, window_bounds = array<i64: 16, 128>}, {transform_indices = @transform_3, window_bounds = array<i64: 16, 128>}, {transform_indices = @transform_4, window_bounds = array<i64: 1, 1>}, {transform_indices = @transform_5, window_bounds = array<i64: 1, 3>}]} {
    %c0_i32 = arith.constant 0 : i32
    %0 = arith.cmpi eq, %arg0, %c0_i32 : i32
    %1 = arith.extui %0 : i1 to i32
    %c0_i32_0 = arith.constant 0 : i32
    %2 = arith.cmpi ne, %1, %c0_i32_0 : i32
    scf.if %2 {
      %cst = arith.constant 0.000000e+00 : f32
      %34 = vector.broadcast %cst : f32 to vector<3x16x128xf32>
      %c0_26 = arith.constant 0 : index
      %c0_27 = arith.constant 0 : index
      %c0_28 = arith.constant 0 : index
      %35 = vector.load %arg8[%c0_26, %c0_27, %c0_28] : memref<3x16x128xf32, #tpu.memory_space<vmem>>, vector<3x16x128xf32>
      tpu.vector_store %arg8[%c0_26, %c0_27, %c0_28], %34 {strides = array<i32>} : memref<3x16x128xf32, #tpu.memory_space<vmem>>, vector<3x16x128xf32>,
    } else {
    }
    %c0 = arith.constant 0 : index
    %c0_1 = arith.constant 0 : index
    %3 = vector.load %arg5[%c0, %c0_1] : memref<16x128xf32, #tpu.memory_space<vmem>>, vector<16x128xf32>
    %c0_2 = arith.constant 0 : index
    %c0_3 = arith.constant 0 : index
    %4 = vector.load %arg2[%c0_2, %c0_3] : memref<16x128xf32, #tpu.memory_space<vmem>>, vector<16x128xf32>
    %5 = arith.subf %4, %3 : vector<16x128xf32>
    %c0_4 = arith.constant 0 : index
    %c0_5 = arith.constant 0 : index
    %c0_6 = arith.constant 0 : index
    %6 = vector.load %arg8[%c0_4, %c0_5, %c0_6] : memref<3x16x128xf32, #tpu.memory_space<vmem>>, vector<1x16x128xf32>
    %7 = vector.shape_cast %6 : vector<1x16x128xf32> to vector<16x128xf32>
    %8 = arith.mulf %5, %5 : vector<16x128xf32>
    %9 = arith.addf %7, %8 : vector<16x128xf32>
    %c0_7 = arith.constant 0 : index
    %c0_8 = arith.constant 0 : index
    %c0_9 = arith.constant 0 : index
    %10 = vector.load %arg8[%c0_7, %c0_8, %c0_9] : memref<3x16x128xf32, #tpu.memory_space<vmem>>, vector<1x16x128xf32>
    %11 = vector.shape_cast %10 : vector<1x16x128xf32> to vector<16x128xf32>
    %12 = vector.shape_cast %9 : vector<16x128xf32> to vector<1x16x128xf32>
    tpu.vector_store %arg8[%c0_7, %c0_8, %c0_9], %12 {strides = array<i32>} : memref<3x16x128xf32, #tpu.memory_space<vmem>>, vector<1x16x128xf32>,
    %c0_10 = arith.constant 0 : index
    %c0_11 = arith.constant 0 : index
    %13 = vector.load %arg3[%c0_10, %c0_11] : memref<16x128xf32, #tpu.memory_space<vmem>>, vector<16x128xf32>
    %14 = arith.subf %13, %3 : vector<16x128xf32>
    %c1 = arith.constant 1 : index
    %c0_12 = arith.constant 0 : index
    %c0_13 = arith.constant 0 : index
    %15 = vector.load %arg8[%c1, %c0_12, %c0_13] : memref<3x16x128xf32, #tpu.memory_space<vmem>>, vector<1x16x128xf32>
    %16 = vector.shape_cast %15 : vector<1x16x128xf32> to vector<16x128xf32>
    %17 = arith.mulf %14, %14 : vector<16x128xf32>
    %18 = arith.addf %16, %17 : vector<16x128xf32>
    %c1_14 = arith.constant 1 : index
    %c0_15 = arith.constant 0 : index
    %c0_16 = arith.constant 0 : index
    %19 = vector.load %arg8[%c1_14, %c0_15, %c0_16] : memref<3x16x128xf32, #tpu.memory_space<vmem>>, vector<1x16x128xf32>
    %20 = vector.shape_cast %19 : vector<1x16x128xf32> to vector<16x128xf32>
    %21 = vector.shape_cast %18 : vector<16x128xf32> to vector<1x16x128xf32>
    tpu.vector_store %arg8[%c1_14, %c0_15, %c0_16], %21 {strides = array<i32>} : memref<3x16x128xf32, #tpu.memory_space<vmem>>, vector<1x16x128xf32>,
    %c0_17 = arith.constant 0 : index
    %c0_18 = arith.constant 0 : index
    %22 = vector.load %arg4[%c0_17, %c0_18] : memref<16x128xf32, #tpu.memory_space<vmem>>, vector<16x128xf32>
    %23 = arith.subf %22, %3 : vector<16x128xf32>
    %c2 = arith.constant 2 : index
    %c0_19 = arith.constant 0 : index
    %c0_20 = arith.constant 0 : index
    %24 = vector.load %arg8[%c2, %c0_19, %c0_20] : memref<3x16x128xf32, #tpu.memory_space<vmem>>, vector<1x16x128xf32>
    %25 = vector.shape_cast %24 : vector<1x16x128xf32> to vector<16x128xf32>
    %26 = arith.mulf %23, %23 : vector<16x128xf32>
    %27 = arith.addf %25, %26 : vector<16x128xf32>
    %c2_21 = arith.constant 2 : index
    %c0_22 = arith.constant 0 : index
    %c0_23 = arith.constant 0 : index
    %28 = vector.load %arg8[%c2_21, %c0_22, %c0_23] : memref<3x16x128xf32, #tpu.memory_space<vmem>>, vector<1x16x128xf32>
    %29 = vector.shape_cast %28 : vector<1x16x128xf32> to vector<16x128xf32>
    %30 = vector.shape_cast %27 : vector<16x128xf32> to vector<1x16x128xf32>
    tpu.vector_store %arg8[%c2_21, %c0_22, %c0_23], %30 {strides = array<i32>} : memref<3x16x128xf32, #tpu.memory_space<vmem>>, vector<1x16x128xf32>,
    %c0_i32_24 = arith.constant 0 : i32
    %31 = arith.cmpi eq, %arg0, %c0_i32_24 : i32
    %32 = arith.extui %31 : i1 to i32
    %c0_i32_25 = arith.constant 0 : i32
    %33 = arith.cmpi ne, %32, %c0_i32_25 : i32
    scf.if %33 {
      %c0_26 = arith.constant 0 : index
      %c0_27 = arith.constant 0 : index
      %c0_28 = arith.constant 0 : index
      %34 = vector.load %arg8[%c0_26, %c0_27, %c0_28] : memref<3x16x128xf32, #tpu.memory_space<vmem>>, vector<1x16x128xf32>
      %35 = vector.shape_cast %34 : vector<1x16x128xf32> to vector<16x128xf32>
      %36 = vector.shape_cast %35 : vector<16x128xf32> to vector<1x16x128xf32>
      %cst = arith.constant dense<0.000000e+00> : vector<1xf32>
      %37 = vector.multi_reduction <add>, %36, %cst [1, 2] : vector<1x16x128xf32> to vector<1xf32>
      %38 = vector.shape_cast %37 : vector<1xf32> to vector<1x1x1xf32>
      %39 = vector.extract %38[0, 0, 0] : f32 from vector<1x1x1xf32>
      %c0_29 = arith.constant 0 : index
      %40 = memref.load %arg1[%c0_29] : memref<3xf32, #tpu.memory_space<smem>>
      %41 = arith.mulf %39, %40 : f32
      %c0_30 = arith.constant 0 : index
      %c0_31 = arith.constant 0 : index
      %42 = memref.load %arg7[%c0_30, %c0_31] : memref<1x3xf32, #tpu.memory_space<smem>>
      memref.store %41, %arg7[%c0_30, %c0_31] : memref<1x3xf32, #tpu.memory_space<smem>>
      %cst_32 = arith.constant 0.000000e+00 : f32
      %43 = arith.addf %cst_32, %41 : f32
      %c1_33 = arith.constant 1 : index
      %c0_34 = arith.constant 0 : index
      %c0_35 = arith.constant 0 : index
      %44 = vector.load %arg8[%c1_33, %c0_34, %c0_35] : memref<3x16x128xf32, #tpu.memory_space<vmem>>, vector<1x16x128xf32>
      %45 = vector.shape_cast %44 : vector<1x16x128xf32> to vector<16x128xf32>
      %46 = vector.shape_cast %45 : vector<16x128xf32> to vector<1x16x128xf32>
      %cst_36 = arith.constant dense<0.000000e+00> : vector<1xf32>
      %47 = vector.multi_reduction <add>, %46, %cst_36 [1, 2] : vector<1x16x128xf32> to vector<1xf32>
      %48 = vector.shape_cast %47 : vector<1xf32> to vector<1x1x1xf32>
      %49 = vector.extract %48[0, 0, 0] : f32 from vector<1x1x1xf32>
      %c1_37 = arith.constant 1 : index
      %50 = memref.load %arg1[%c1_37] : memref<3xf32, #tpu.memory_space<smem>>
      %51 = arith.mulf %49, %50 : f32
      %c0_38 = arith.constant 0 : index
      %c1_39 = arith.constant 1 : index
      %52 = memref.load %arg7[%c0_38, %c1_39] : memref<1x3xf32, #tpu.memory_space<smem>>
      memref.store %51, %arg7[%c0_38, %c1_39] : memref<1x3xf32, #tpu.memory_space<smem>>
      %53 = arith.addf %43, %51 : f32
      %c2_40 = arith.constant 2 : index
      %c0_41 = arith.constant 0 : index
      %c0_42 = arith.constant 0 : index
      %54 = vector.load %arg8[%c2_40, %c0_41, %c0_42] : memref<3x16x128xf32, #tpu.memory_space<vmem>>, vector<1x16x128xf32>
      %55 = vector.shape_cast %54 : vector<1x16x128xf32> to vector<16x128xf32>
      %56 = vector.shape_cast %55 : vector<16x128xf32> to vector<1x16x128xf32>
      %cst_43 = arith.constant dense<0.000000e+00> : vector<1xf32>
      %57 = vector.multi_reduction <add>, %56, %cst_43 [1, 2] : vector<1x16x128xf32> to vector<1xf32>
      %58 = vector.shape_cast %57 : vector<1xf32> to vector<1x1x1xf32>
      %59 = vector.extract %58[0, 0, 0] : f32 from vector<1x1x1xf32>
      %c2_44 = arith.constant 2 : index
      %60 = memref.load %arg1[%c2_44] : memref<3xf32, #tpu.memory_space<smem>>
      %61 = arith.mulf %59, %60 : f32
      %c0_45 = arith.constant 0 : index
      %c2_46 = arith.constant 2 : index
      %62 = memref.load %arg7[%c0_45, %c2_46] : memref<1x3xf32, #tpu.memory_space<smem>>
      memref.store %61, %arg7[%c0_45, %c2_46] : memref<1x3xf32, #tpu.memory_space<smem>>
      %63 = arith.addf %53, %61 : f32
      %c0_47 = arith.constant 0 : index
      %c0_48 = arith.constant 0 : index
      %64 = memref.load %arg6[%c0_47, %c0_48] : memref<1x1xf32, #tpu.memory_space<smem>>
      memref.store %63, %arg6[%c0_47, %c0_48] : memref<1x1xf32, #tpu.memory_space<smem>>
    } else {
    }
    return
  }
  func.func @transform_0(%arg0: i32, %arg1: memref<3xf32, #tpu.memory_space<smem>>) -> (i32, i32) {
    %c0_i32 = arith.constant 0 : i32
    %c0_i32_0 = arith.constant 0 : i32
    return %arg0, %c0_i32 : i32, i32
  }
  func.func @transform_1(%arg0: i32, %arg1: memref<3xf32, #tpu.memory_space<smem>>) -> (i32, i32) {
    %c0_i32 = arith.constant 0 : i32
    %c0_i32_0 = arith.constant 0 : i32
    return %arg0, %c0_i32 : i32, i32
  }
  func.func @transform_2(%arg0: i32, %arg1: memref<3xf32, #tpu.memory_space<smem>>) -> (i32, i32) {
    %c0_i32 = arith.constant 0 : i32
    %c0_i32_0 = arith.constant 0 : i32
    return %arg0, %c0_i32 : i32, i32
  }
  func.func @transform_3(%arg0: i32, %arg1: memref<3xf32, #tpu.memory_space<smem>>) -> (i32, i32) {
    %c0_i32 = arith.constant 0 : i32
    %c0_i32_0 = arith.constant 0 : i32
    return %arg0, %c0_i32 : i32, i32
  }
  func.func @transform_4(%arg0: i32, %arg1: memref<3xf32, #tpu.memory_space<smem>>) -> (i32, i32) {
    %c0_i32 = arith.constant 0 : i32
    %c0_i32_0 = arith.constant 0 : i32
    %c0_i32_1 = arith.constant 0 : i32
    return %c0_i32, %c0_i32_0 : i32, i32
  }
  func.func @transform_5(%arg0: i32, %arg1: memref<3xf32, #tpu.memory_space<smem>>) -> (i32, i32) {
    %c0_i32 = arith.constant 0 : i32
    %c0_i32_0 = arith.constant 0 : i32
    %c0_i32_1 = arith.constant 0 : i32
    return %c0_i32, %c0_i32_0 : i32, i32
  }
}

</mosaic_0001>

<bundles_post_ra>
// kernel: tpu_custom_call.1
= control target key start
LH: loop header
LB: loop body
LE: loop exit
PB: predicated region body
PF: predicated region fallthrough
CT: control target
= control target key end

     0   :  { %s516_s0 = inlined_call_operand.hbm [shape: f32[3], index: 0, kind: input, shape index: {}]   ;;  %s517_s1 = inlined_call_operand.hbm [shape: f32[16,128], index: 1, kind: input, shape index: {}]   ;;  %s518_s2 = inlined_call_operand.hbm [shape: f32[16,128], index: 2, kind: input, shape index: {}]   ;;  %s519_s3 = inlined_call_operand.hbm [shape: f32[16,128], index: 3, kind: input, shape index: {}]   ;;  %s520_s4 = inlined_call_operand.hbm [shape: f32[16,128], index: 4, kind: input, shape index: {}]   ;;  %s521_s5 = inlined_call_operand.hbm [shape: f32[1,1], index: 5, kind: output, shape index: {0}]   ;;  %s522_s6 = inlined_call_operand.hbm [shape: f32[1,3], index: 6, kind: output, shape index: {1}]  }
   0x1   :  { %s232_s23 = scalar_lea.hbm %s516_s0, 16 }
   0x2   :  { %p233_p0 = scmp.ne.s32.totalorder %s516_s0, %s232_s23  ;;  %p236_p1 = scmp.lt.u32.totalorder %s232_s23, %s516_s0 }
   0x4   :  { %p238_p2 = pnand %p236_p1, %p233_p0 }
   0x6   :  { %241 = shalt.err (!%p238_p2)  }
   0x7   :  { %s362_s28 = smov [#allocation4]  }
   0x8   :  { %13 = dma.hbm_to_smem %s516_s0, 16, %s362_s28, [#allocation3] }
   0x9   :  { %350 = dma.done.wait [#allocation3], 16 }
   0xa   :  { %351 = vsyncadd [#allocation3], 4294967280 }
   0xb   :  { %15 = sfence }
   0xc   :  { %16 = vsyncpa [#allocation6], 0 }
   0xd   :  { %17 = vsyncpa [#allocation9], 0 }
   0xe   :  { %18 = vsyncpa [#allocation12], 0 }
   0xf   :  { %19 = vsyncpa [#allocation7], 0 }
  0x10   :  { %20 = vsyncpa [#allocation15], 0  ;;  %s363_s7 = smov [#allocation8]   ;;  %s364_s9 = smov [#allocation5]  }
  0x11   :  { %s38_s8 = sshll.u32 %s363_s7, 4  ;;  %s26_s10 = sshll.u32 %s364_s9, 4  ;;  %s39_s8 = int_to_ptr.vmem [resolvable:$true] %s38_s8  ;;  %s418_s10 = int_to_ptr.vmem [resolvable:$true] %s26_s10 }
  0x12   :  { %s242_s13 = scalar_lea.hbm %s518_s2, 256 }
  0x13   :  { %p243_p3 = scmp.ne.s32.totalorder %s518_s2, %s242_s13  ;;  %p246_p4 = scmp.lt.u32.totalorder %s242_s13, %s518_s2 }
  0x15   :  { %p248_p5 = pnand %p246_p4, %p243_p3 }
  0x17   :  { %251 = shalt.err (!%p248_p5)
}
  0x18   :  { %s252_s17 = scalar_lea.vmem %s39_s8, 256  ;;  %p257_p7 = scmp.lt.s32.totalorder %s39_s8, %s39_s8 }
  0x19   :  { %p253_p6 = scmp.ne.s32.totalorder %s39_s8, %s252_s17  ;;  %p258_p8 = scmp.lt.s32.totalorder %s252_s17, %s252_s17 }
  0x1b   :  { %p259_p9 = por %p258_p8, %p257_p7 }
  0x1d   :  { %p260_p10 = pnand %p259_p9, %p253_p6 }
  0x1f   :  { %263 = shalt.err (!%p260_p10)
}
  0x20   :  { %s365_s18 = smov 128   ;;  %s366_s19 = smov 8  }
  0x21   :  { %44 = dma.hbm_to_vmem [thread:$0]  %s518_s2, 256, %s39_s8, [#allocation9], %s365_s18, %s365_s18, %s366_s19  }
  0x22   :  { %s264_s24 = scalar_lea.hbm %s517_s1, 256 }
  0x23   :  { %p265_p11 = scmp.ne.s32.totalorder %s517_s1, %s264_s24  ;;  %p268_p12 = scmp.lt.u32.totalorder %s264_s24, %s517_s1 }
  0x25   :  { %p270_p13 = pnand %p268_p12, %p265_p11 }
  0x27   :  { %273 = shalt.err (!%p270_p13)
}
  0x28   :  { %s274_s29 = scalar_lea.vmem %s418_s10, 256  ;;  %p279_p1 = scmp.lt.s32.totalorder %s418_s10, %s418_s10 }
  0x29   :  { %p275_p0 = scmp.ne.s32.totalorder %s418_s10, %s274_s29  ;;  %p280_p2 = scmp.lt.s32.totalorder %s274_s29, %s274_s29 }
  0x2b   :  { %p281_p3 = por %p280_p2, %p279_p1 }
  0x2d   :  { %p282_p4 = pnand %p281_p3, %p275_p0 }
  0x2f   :  { %285 = shalt.err (!%p282_p4)
}
  0x30   :  { %32 = dma.hbm_to_vmem [thread:$0]  %s517_s1, 256, %s418_s10, [#allocation6], %s365_s18, %s365_s18, %s366_s19  }
  0x31   :  { %s367_s7 = smov [#allocation10]   ;;  %s368_s9 = smov [#allocation11]  }
  0x32   :  { %s50_s8 = sshll.u32 %s367_s7, 4  ;;  %s62_s11 = sshll.u32 %s368_s9, 4  ;;  %s51_s8 = int_to_ptr.vmem [resolvable:$true] %s50_s8  ;;  %s455_s11 = int_to_ptr.vmem [resolvable:$true] %s62_s11 }
  0x33   :  { %s286_s0 = scalar_lea.hbm %s519_s3, 256 }
  0x34   :  { %p287_p5 = scmp.ne.s32.totalorder %s519_s3, %s286_s0  ;;  %p290_p6 = scmp.lt.u32.totalorder %s286_s0, %s519_s3 }
  0x36   :  { %p292_p7 = pnand %p290_p6, %p287_p5 }
  0x38   :  { %295 = shalt.err (!%p292_p7)
}
  0x39   :  { %s296_s1 = scalar_lea.vmem %s51_s8, 256  ;;  %p301_p9 = scmp.lt.s32.totalorder %s51_s8, %s51_s8 }
  0x3a   :  { %p297_p8 = scmp.ne.s32.totalorder %s51_s8, %s296_s1  ;;  %p302_p10 = scmp.lt.s32.totalorder %s296_s1, %s296_s1 }
  0x3c   :  { %p303_p11 = por %p302_p10, %p301_p9 }
  0x3e   :  { %p304_p12 = pnand %p303_p11, %p297_p8 }
  0x40   :  { %307 = shalt.err (!%p304_p12)
}
  0x41   :  { %56 = dma.hbm_to_vmem [thread:$0]  %s519_s3, 256, %s51_s8, [#allocation9], %s365_s18, %s365_s18, %s366_s19  }
  0x42   :  { %s308_s23 = scalar_lea.hbm %s520_s4, 256 }
  0x43   :  { %p309_p13 = scmp.ne.s32.totalorder %s520_s4, %s308_s23  ;;  %p312_p0 = scmp.lt.u32.totalorder %s308_s23, %s520_s4 }
  0x45   :  { %p314_p1 = pnand %p312_p0, %p309_p13 }
  0x47   :  { %317 = shalt.err (!%p314_p1)
}
  0x48   :  { %s318_s28 = scalar_lea.vmem %s455_s11, 256  ;;  %p323_p3 = scmp.lt.s32.totalorder %s455_s11, %s455_s11 }
  0x49   :  { %p319_p2 = scmp.ne.s32.totalorder %s455_s11, %s318_s28  ;;  %p324_p4 = scmp.lt.s32.totalorder %s318_s28, %s318_s28 }
  0x4b   :  { %p325_p5 = por %p324_p4, %p323_p3 }
  0x4d   :  { %p326_p6 = pnand %p325_p5, %p319_p2 }
  0x4f   :  { %329 = shalt.err (!%p326_p6)
}
  0x50   :  { %68 = dma.hbm_to_vmem [thread:$0]  %s520_s4, 256, %s455_s11, [#allocation12], %s365_s18, %s365_s18, %s366_s19  }
  0x51   :  { %352 = dma.done.wait [#allocation6], 256  }
  0x52   :  { %353 = vsyncadd [#allocation6], 4294967040 }
  0x53   :  { %354 = dma.done.wait [#allocation9], 512  }
  0x54   :  { %355 = vsyncadd [#allocation9], 4294966784 }
  0x55   :  { %356 = dma.done.wait [#allocation12], 256  }
  0x56   :  { %357 = vsyncadd [#allocation12], 4294967040  ;;  %v91_v0 = vld [vmem:[#allocation11] sm:$0xff]  ;;  %v92_v1 = vld [vmem:[#allocation11 + $0x8] sm:$0xff]  ;;  %s146_s4 = sld [smem:[#allocation4]]  ;;  %s215_s18 = sld [smem:[#allocation4 + $0x1]] }
  0x57   :  { %v118_v2 = vld [vmem:[#allocation10] sm:$0xff]  ;;  %v119_v3 = vld [vmem:[#allocation10 + $0x8] sm:$0xff]  ;;  %v105_v10 = vld [vmem:[#allocation8] sm:$0xff]  ;;  %s216_s19 = sld [smem:[#allocation4 + $0x2]]  ;;  %s330_s15 = scalar_lea.hbm %s522_s6, 16 }
  0x58   :  { %v120_v4 = vsub.f32 %v118_v2, %v91_v0  ;;  %v93_v5 = vld [vmem:[#allocation5] sm:$0xff]  ;;  %v94_v6 = vld [vmem:[#allocation5 + $0x8] sm:$0xff]  ;;  %v121_v7 = vsub.f32 %v119_v3, %v92_v1  ;;  %v106_v11 = vld [vmem:[#allocation8 + $0x8] sm:$0xff]  ;;  %v107_v13 = vsub.f32 %v105_v10, %v91_v0  ;;  %p331_p7 = scmp.ne.s32.totalorder %s522_s6, %s330_s15  ;;  %p334_p8 = scmp.lt.u32.totalorder %s330_s15, %s522_s6 }
  0x59   :  { %v95_v8 = vsub.f32 %v93_v5, %v91_v0  ;;  %v96_v9 = vsub.f32 %v94_v6, %v92_v1  ;;  %v108_v14 = vsub.f32 %v106_v11, %v92_v1 }
  0x5a   :  { %v125_v12 = vmul.f32 %v120_v4, %v120_v4  ;;  %v126_v15 = vmul.f32 %v121_v7, %v121_v7  ;;  %v112_v18 = vmul.f32 %v107_v13, %v107_v13  ;;  %p336_p9 = pnand %p334_p8, %p331_p7 }
  0x5b   :  { %v99_v16 = vmul.f32 %v95_v8, %v95_v8  ;;  %v100_v17 = vmul.f32 %v96_v9, %v96_v9  ;;  %v113_v19 = vmul.f32 %v108_v14, %v108_v14 }
  0x5c   :  { %v170_v20 = vadd.f32 %v126_v15, %v125_v12 }
  0x5d   :  { %v136_v21 = vadd.f32 %v100_v17, %v99_v16  ;;  %v153_v22 = vadd.f32 %v113_v19, %v112_v18 }
  0x5e   :  { %171 = vadd.xlane.f32.xlu1 %v170_v20 }
  0x5f   :  { %137 = vadd.xlane.f32.xlu0 %v136_v21 }
  0x63   :  { %154 = vadd.xlane.f32.xlu0 %v153_v22 }
  0xeb   :  { %v172_v23 = vpop.xlane.xlu1 %171 }
  0xec   :  { %v138_v24 = vpop.xlane.xlu0 %137  ;;  %v173_v25 = vrot.slane %v172_v23, 4 }
  0xed   :  { %v139_v26 = vrot.slane %v138_v24, 4 }
  0xee   :  { %v174_v27 = vadd.f32 %v173_v25, %v172_v23 }
  0xef   :  { %v140_v28 = vadd.f32 %v139_v26, %v138_v24 }
  0xf0   :  { %v155_v29 = vpop.xlane.xlu0 %154  ;;  %v175_v30 = vrot.slane %v174_v27, 2 }
  0xf1   :  { %v141_v31 = vrot.slane %v140_v28, 2  ;;  %v156_v32 = vrot.slane %v155_v29, 4 }
  0xf2   :  { %v176_v35 = vadd.f32 %v175_v30, %v174_v27 }
  0xf3   :  { %v157_v33 = vadd.f32 %v156_v32, %v155_v29  ;;  %v142_v34 = vadd.f32 %v141_v31, %v140_v28 }
  0xf4   :  { %v177_v40 = vrot.slane %v176_v35, 1 }
  0xf5   :  { %v158_v36 = vrot.slane %v157_v33, 2  ;;  %v143_v37 = vrot.slane %v142_v34, 1 }
  0xf6   :  { %v178_v43 = vadd.f32 %v177_v40, %v176_v35 }
  0xf7   :  { %v159_v38 = vadd.f32 %v158_v36, %v157_v33  ;;  %v144_v39 = vadd.f32 %v143_v37, %v142_v34 }
  0xf9   :  { %217 = vpush %v144_v39  ;;  %v160_v41 = vrot.slane %v159_v38, 1 }
  0xfb   :  { %v161_v42 = vadd.f32 %v160_v41, %v159_v38 }
  0xfd   :  { %219 = vpush %v161_v42 }
  0xfe   :  { %221 = vpush %v178_v43 }
 0x12a   :  { %s218_s2 = spop %217 }
 0x12b   :  { %s147_s30 = smul.f32 %s218_s2, %s146_s4 }
 0x12d   :  { %149 = sst [smem:[#allocation14]] %s147_s30 }
 0x12e   :  { %s220_s7 = spop %219 }
 0x12f   :  { %s164_s8 = smul.f32 %s220_s7, %s215_s18  ;;  %s222_s9 = spop %221 }
 0x130   :  { %s181_s11 = smul.f32 %s222_s9, %s216_s19 }
 0x131   :  { %166 = sst [smem:[#allocation14 + $0x1]] %s164_s8 }
 0x132   :  { %s167_s12 = sadd.f32 %s164_s8, %s147_s30 }
 0x133   :  { %183 = sst [smem:[#allocation14 + $0x2]] %s181_s11 }
 0x134   :  { %s184_s13 = sadd.f32 %s181_s11, %s167_s12 }
 0x135   :  { %339 = shalt.err (!%p336_p9)
}
 0x136   :  { %s369_s20 = smov [#allocation14]   ;;  %186 = sst [smem:[#allocation13]] %s184_s13 }
 0x137   :  { %202 = dma.smem_to_hbm %s369_s20, 16, %s522_s6, [#allocation15]  }
 0x138   :  { %s340_s25 = scalar_lea.hbm %s521_s5, 16 }
 0x139   :  { %p341_p10 = scmp.ne.s32.totalorder %s521_s5, %s340_s25  ;;  %p344_p11 = scmp.lt.u32.totalorder %s340_s25, %s521_s5 }
 0x13b   :  { %p346_p12 = pnand %p344_p11, %p341_p10 }
 0x13d   :  { %349 = shalt.err (!%p346_p12)
}
 0x13e   :  { %s370_s29 = smov [#allocation13]  }
 0x13f   :  { %194 = dma.smem_to_hbm %s370_s29, 16, %s521_s5, [#allocation7]  }
 0x140   :  { %358 = dma.done.wait [#allocation7], 16  }
 0x141   :  { %359 = vsyncadd [#allocation7], 4294967280 }
 0x142   :  { %360 = dma.done.wait [#allocation15], 16  }
 0x143   :  { %361 = vsyncadd [#allocation15], 4294967280 }
 0x144   :  { %209 = sfence }
 0x145   :  { %210 = vsyncpa [#allocation6], 1 }
 0x146   :  { %211 = vsyncpa [#allocation9], 1 }
 0x147   :  { %212 = vsyncpa [#allocation12], 1 }
 0x148   :  { %213 = vsyncpa [#allocation7], 1 }
 0x149   :  { %214 = vsyncpa [#allocation15], 1 }

</bundles_post_ra>
